<compile_context>
chip_gen: v6e
topology: v6e:2x2x1
jax: 0.10.0
libtpu: 0.0.40
codegen_flags: <defaults>
</compile_context>

<pallas_src>
import jax
import jax.numpy as jnp
from jax.experimental import pallas as pl
from jax.experimental.pallas import tpu as pltpu

BN_EPS = 1e-5
LANE = 128


def batch_dence_kernel(x_ref, w_ref, gamma_ref, beta_ref, o_ref):
    # ---- Linear (bias omitted: exactly cancelled by BN mean subtraction) ----
    # bf16 operands, f32 accumulation on the MXU.
    y = jnp.dot(x_ref[...], w_ref[...], preferred_element_type=jnp.float32)  # (N, TO) f32

    # ---- BatchNorm1d (training mode, biased variance) folded to scale/shift ----
    n = y.shape[0]
    inv_n = 1.0 / n
    mean = jnp.sum(y, axis=0, keepdims=True) * inv_n           # (1, TO)
    mean_sq = jnp.sum(y * y, axis=0, keepdims=True) * inv_n    # (1, TO)
    var = mean_sq - mean * mean
    inv_std = jax.lax.rsqrt(var + BN_EPS)
    scale = gamma_ref[...] * inv_std                           # (1, TO)
    shift = beta_ref[...] - mean * scale                       # (1, TO)
    z = y * scale + shift                                      # 2 VPU ops/elem

    # ---- Swish: z * sigmoid(z); exp + reciprocal stay on the EUP slot ----
    sig = pl.reciprocal(1.0 + jnp.exp(-z), approx=True)
    o_ref[...] = (z * sig).astype(o_ref.dtype)


def _round_up(x, m):
    return ((x + m - 1) // m) * m


def _vmem_budget_bytes():
    try:
        cap = pltpu.get_tpu_info().vmem_capacity_bytes
    except Exception:
        cap = 64 * 1024 * 1024
    # leave headroom; cap at ~100 MiB (v5e/v6e), lands near ~48 MiB on v7x
    return max(16 * 1024 * 1024, min(cap - 16 * 1024 * 1024, 100 * 1024 * 1024))


def _pick_block_o(n, i, o_pad, budget):
    """Largest O tile (multiple of 128, divides o_pad, <= 512) fitting the budget."""
    to = min(512, o_pad)
    while to > LANE:
        # resident bf16 x + double-buffered bf16 W tile + double-buffered f32 out
        # tile + gamma/beta tiles
        fp = 2 * n * i + 2 * (2 * i * to) + 2 * (4 * n * to) + 4 * (4 * to)
        if o_pad % to == 0 and fp <= budget:
            break
        to -= LANE
    return to


def batch_dence(x, w, b, gamma, beta):
    """Fused Linear -> BatchNorm1d (training batch stats) -> Swish.

    x: (N, I) f32; w: (I, O); b: (O,) linear bias (accepted for module parity but
    unused: it is exactly cancelled by the batch-mean subtraction); gamma, beta:
    (O,) BatchNorm affine. Returns (N, O) f32.
    """
    del b  # mathematically a no-op under training-mode BatchNorm
    N, I = x.shape
    O = w.shape[1]

    budget = _vmem_budget_bytes()
    o_pad = _round_up(O, LANE)
    block_o = _pick_block_o(N, I, o_pad, budget)
    num_tiles = o_pad // block_o

    # Lane-dense padding of the feature axis. Padded features are harmless:
    # y=0 -> var=0 -> inv_std finite -> z=beta_pad=0; they are sliced off below.
    w_p = jnp.zeros((I, o_pad), w.dtype).at[:, :O].set(w)
    g_p = jnp.ones((1, o_pad), jnp.float32).at[0, :O].set(gamma.astype(jnp.float32))
    be_p = jnp.zeros((1, o_pad), jnp.float32).at[0, :O].set(beta.astype(jnp.float32))

    # bf16 MXU operands: halves x/W DMA bytes, 2x MXU rate; accumulation stays f32.
    x_bf = x.astype(jnp.bfloat16)
    w_bf = w_p.astype(jnp.bfloat16)

    # TODO(synk): for batches too large to keep the (N, I) / (N, TO) blocks resident
    # in VMEM, switch to a two-pass N-tiled design that accumulates sum(y), sum(y^2)
    # per feature tile (pl.when-init scratch) before the scale/shift + swish pass.
    out = pl.pallas_call(
        batch_dence_kernel,
        out_shape=jax.ShapeDtypeStruct((N, o_pad), jnp.float32),
        grid_spec=pltpu.PrefetchScalarGridSpec(
            num_scalar_prefetch=0,
            grid=(num_tiles,),
            in_specs=[
                pl.BlockSpec((N, I), lambda j: (0, 0)),        # x: full batch, resident
                pl.BlockSpec((I, block_o), lambda j: (0, j)),  # W feature tile
                pl.BlockSpec((1, block_o), lambda j: (0, j)),  # gamma tile
                pl.BlockSpec((1, block_o), lambda j: (0, j)),  # beta tile
            ],
            out_specs=pl.BlockSpec((N, block_o), lambda j: (0, j)),
        ),
        compiler_params=pltpu.CompilerParams(
            # BN stats are per-feature, so O tiles are fully independent.
            dimension_semantics=("parallel",),
            vmem_limit_bytes=budget,
        ),
    )(x_bf, w_bf, g_p, be_p)
    return out[:, :O]


def reference(x, w, b, gamma, beta):
    """Module semantics (Linear WITH bias -> BN training stats -> Swish), with the
    matmul done at the same bf16-input / f32-accum precision as the kernel."""
    y = jnp.dot(x.astype(jnp.bfloat16), w.astype(jnp.bfloat16),
                preferred_element_type=jnp.float32) + b
    mean = jnp.mean(y, axis=0, keepdims=True)
    var = jnp.mean((y - mean) ** 2, axis=0, keepdims=True)
    z = gamma * (y - mean) / jnp.sqrt(var + BN_EPS) + beta
    return z * jax.nn.sigmoid(z)


if __name__ == "__main__":
    key = jax.random.PRNGKey(0)
    N, I, O = 8, 32, 32   # batch, i_dim, o_dim

    kx, kw, kb = jax.random.split(key, 3)
    x = jax.random.normal(kx, (N, I), dtype=jnp.float32)

    # Mimic nn.Linear's uniform(-1/sqrt(I), 1/sqrt(I)) init; BN init gamma=1, beta=0.
    bound = 1.0 / (I ** 0.5)
    w = jax.random.uniform(kw, (I, O), minval=-bound, maxval=bound, dtype=jnp.float32)
    b = jax.random.uniform(kb, (O,), minval=-bound, maxval=bound, dtype=jnp.float32)
    gamma = jnp.ones((O,), dtype=jnp.float32)
    beta = jnp.zeros((O,), dtype=jnp.float32)

    out = batch_dence(x, w, b, gamma, beta)
    jax.block_until_ready(out)

    ref = reference(x, w, b, gamma, beta)
    assert out.shape == (N, O)
    # Kernel drops the (cancelled) bias and uses E[y^2]-mean^2 + approx reciprocal;
    # tolerance covers those reassociations on top of the shared bf16 matmul.
    assert jnp.allclose(out, ref, atol=1e-2, rtol=1e-2), "mismatch vs reference"

    print("KERNEL_OK")
</pallas_src>

<mosaic_0001>
module attributes {stable_mosaic.version = 11 : i64} {
  func.func @batch_dence_kernel(%arg0: i32, %arg1: memref<8x32xbf16, #tpu.memory_space<vmem>>, %arg2: memref<32x128xbf16, #tpu.memory_space<vmem>>, %arg3: memref<1x128xf32, #tpu.memory_space<vmem>>, %arg4: memref<1x128xf32, #tpu.memory_space<vmem>>, %arg5: memref<8x128xf32, #tpu.memory_space<vmem>>) attributes {dimension_semantics = [#tpu.dimension_semantics<parallel>], iteration_bounds = array<i64: 1>, scalar_prefetch = 0 : i64, scratch_operands = 0 : i64, tpu.core_type = #tpu.core_type<tc>, window_params = [{pipeline_mode = #tpu.pipeline_mode<synchronous>, transform_indices = @transform_0, window_bounds = array<i64: 8, 32>}, {transform_indices = @transform_1, window_bounds = array<i64: 32, 128>}, {transform_indices = @transform_2, window_bounds = array<i64: 1, 128>}, {transform_indices = @transform_3, window_bounds = array<i64: 1, 128>}, {transform_indices = @transform_4, window_bounds = array<i64: 8, 128>}]} {
    %c0 = arith.constant 0 : index
    %c0_0 = arith.constant 0 : index
    %0 = vector.load %arg1[%c0, %c0_0] : memref<8x32xbf16, #tpu.memory_space<vmem>>, vector<8x32xbf16>
    %c0_1 = arith.constant 0 : index
    %c0_2 = arith.constant 0 : index
    %1 = vector.load %arg2[%c0_1, %c0_2] : memref<32x128xbf16, #tpu.memory_space<vmem>>, vector<32x128xbf16>
    %cst = arith.constant dense<0.000000e+00> : vector<8x128xf32>
    %2 = tpu.matmul %0, %1, %cst {dimension_numbers = #tpu.dot_dimension_numbers<[1], [0], [0], [1], [0, 0, 1, 1], [], []>} : vector<8x32xbf16>, vector<32x128xbf16>, vector<8x128xf32> -> vector<8x128xf32>
    %cst_3 = arith.constant dense<0.000000e+00> : vector<128xf32>
    %3 = vector.multi_reduction <add>, %2, %cst_3 [0] : vector<8x128xf32> to vector<128xf32>
    %4 = vector.shape_cast %3 : vector<128xf32> to vector<1x128xf32>
    %cst_4 = arith.constant 1.250000e-01 : f32
    %5 = vector.broadcast %cst_4 : f32 to vector<1x128xf32>
    %6 = arith.mulf %4, %5 : vector<1x128xf32>
    %7 = arith.mulf %2, %2 : vector<8x128xf32>
    %cst_5 = arith.constant dense<0.000000e+00> : vector<128xf32>
    %8 = vector.multi_reduction <add>, %7, %cst_5 [0] : vector<8x128xf32> to vector<128xf32>
    %9 = vector.shape_cast %8 : vector<128xf32> to vector<1x128xf32>
    %cst_6 = arith.constant 1.250000e-01 : f32
    %10 = vector.broadcast %cst_6 : f32 to vector<1x128xf32>
    %11 = arith.mulf %9, %10 : vector<1x128xf32>
    %12 = arith.mulf %6, %6 : vector<1x128xf32>
    %13 = arith.subf %11, %12 : vector<1x128xf32>
    %cst_7 = arith.constant 9.99999974E-6 : f32
    %14 = vector.broadcast %cst_7 : f32 to vector<1x128xf32>
    %15 = arith.addf %13, %14 : vector<1x128xf32>
    %16 = math.rsqrt %15 : vector<1x128xf32>
    %c0_8 = arith.constant 0 : index
    %c0_9 = arith.constant 0 : index
    %17 = vector.load %arg3[%c0_8, %c0_9] : memref<1x128xf32, #tpu.memory_space<vmem>>, vector<1x128xf32>
    %18 = arith.mulf %17, %16 : vector<1x128xf32>
    %c0_10 = arith.constant 0 : index
    %c0_11 = arith.constant 0 : index
    %19 = vector.load %arg4[%c0_10, %c0_11] : memref<1x128xf32, #tpu.memory_space<vmem>>, vector<1x128xf32>
    %20 = arith.mulf %6, %18 : vector<1x128xf32>
    %21 = arith.subf %19, %20 : vector<1x128xf32>
    %22 = vector.broadcast %18 : vector<1x128xf32> to vector<8x128xf32>
    %23 = arith.mulf %2, %22 : vector<8x128xf32>
    %24 = vector.broadcast %21 : vector<1x128xf32> to vector<8x128xf32>
    %25 = arith.addf %23, %24 : vector<8x128xf32>
    %cst_12 = arith.constant 0.000000e+00 : f32
    %26 = vector.broadcast %cst_12 : f32 to vector<8x128xf32>
    %27 = arith.subf %26, %25 : vector<8x128xf32>
    %28 = math.exp %27 : vector<8x128xf32>
    %cst_13 = arith.constant 1.000000e+00 : f32
    %29 = vector.broadcast %cst_13 : f32 to vector<8x128xf32>
    %30 = arith.addf %29, %28 : vector<8x128xf32>
    %31 = tpu.reciprocal %30 {approx = true} : vector<8x128xf32> -> vector<8x128xf32>
    %32 = arith.mulf %25, %31 : vector<8x128xf32>
    %c0_14 = arith.constant 0 : index
    %c0_15 = arith.constant 0 : index
    %33 = vector.load %arg5[%c0_14, %c0_15] : memref<8x128xf32, #tpu.memory_space<vmem>>, vector<8x128xf32>
    tpu.vector_store %arg5[%c0_14, %c0_15], %32 {strides = array<i32>} : memref<8x128xf32, #tpu.memory_space<vmem>>, vector<8x128xf32>,
    return
  }
  func.func @transform_0(%arg0: i32) -> (i32, i32) {
    %c0_i32 = arith.constant 0 : i32
    %c0_i32_0 = arith.constant 0 : i32
    %c0_i32_1 = arith.constant 0 : i32
    return %c0_i32, %c0_i32_0 : i32, i32
  }
  func.func @transform_1(%arg0: i32) -> (i32, i32) {
    %c0_i32 = arith.constant 0 : i32
    %c0_i32_0 = arith.constant 0 : i32
    return %c0_i32, %arg0 : i32, i32
  }
  func.func @transform_2(%arg0: i32) -> (i32, i32) {
    %c0_i32 = arith.constant 0 : i32
    %c0_i32_0 = arith.constant 0 : i32
    return %c0_i32, %arg0 : i32, i32
  }
  func.func @transform_3(%arg0: i32) -> (i32, i32) {
    %c0_i32 = arith.constant 0 : i32
    %c0_i32_0 = arith.constant 0 : i32
    return %c0_i32, %arg0 : i32, i32
  }
  func.func @transform_4(%arg0: i32) -> (i32, i32) {
    %c0_i32 = arith.constant 0 : i32
    %c0_i32_0 = arith.constant 0 : i32
    return %c0_i32, %arg0 : i32, i32
  }
}

</mosaic_0001>

<bundles_post_ra>
// kernel: tpu_custom_call.1
= control target key start
LH: loop header
LB: loop body
LE: loop exit
PB: predicated region body
PF: predicated region fallthrough
CT: control target
= control target key end

     0   :  { %9 = vsyncpa [#allocation3], 0  ;;  %s309_s0 = inlined_call_operand.hbm [shape: bf16[8,32], index: 0, kind: input, shape index: {}]   ;;  %s310_s1 = inlined_call_operand.hbm [shape: bf16[32,128], index: 1, kind: input, shape index: {}]   ;;  %s311_s2 = inlined_call_operand.vmem [shape: f32[1,128], index: 2, kind: input, shape index: {}]   ;;  %s312_s3 = inlined_call_operand.vmem [shape: f32[1,128], index: 3, kind: input, shape index: {}]   ;;  %s313_s4 = inlined_call_operand.hbm [shape: f32[8,128], index: 4, kind: output, shape index: {}]  }
   0x1   :  { %10 = vsyncpa [#allocation6], 0 }
   0x2   :  { %11 = vsyncpa [#allocation4], 0  ;;  %s262_s15 = smov [#allocation2]   ;;  %s263_s17 = smov [#allocation5]  }
   0x3   :  { %s18_s16 = sshll.u32 %s262_s15, 4  ;;  %s27_s18 = sshll.u32 %s263_s17, 4  ;;  %s19_s16 = int_to_ptr.vmem [resolvable:$true] %s18_s16  ;;  %s28_s18 = int_to_ptr.vmem [resolvable:$true] %s27_s18 }
   0x4   :  { %s204_s19 = scalar_lea.vmem %s19_s16, 64  ;;  %p209_p1 = scmp.lt.s32.totalorder %s19_s16, %s19_s16 }
   0x5   :  { %p205_p0 = scmp.ne.s32.totalorder %s19_s16, %s204_s19  ;;  %p210_p2 = scmp.lt.s32.totalorder %s204_s19, %s204_s19 }
   0x7   :  { %p211_p3 = por %p210_p2, %p209_p1 }
   0x9   :  { %p212_p4 = pnand %p211_p3, %p205_p0 }
   0xb   :  { %215 = shalt.err (!%p212_p4)
}
   0xc   :  { %21 = dma.hbm_to_vmem [thread:$0]  %s309_s0, 64, %s19_s16, [#allocation3]  }
   0xd   :  { %s224_s22 = scalar_lea.vmem %s28_s18, 256  ;;  %p229_p6 = scmp.lt.s32.totalorder %s28_s18, %s28_s18 }
   0xe   :  { %p225_p5 = scmp.ne.s32.totalorder %s28_s18, %s224_s22  ;;  %p230_p7 = scmp.lt.s32.totalorder %s224_s22, %s224_s22 }
  0x10   :  { %p231_p8 = por %p230_p7, %p229_p6 }
  0x12   :  { %p232_p9 = pnand %p231_p8, %p225_p5 }
  0x14   :  { %235 = shalt.err (!%p232_p9)
}
  0x15   :  { %s264_s23 = smov 64   ;;  %s265_s24 = smov 4  }
  0x16   :  { %33 = dma.hbm_to_vmem [thread:$0]  %s310_s1, 256, %s28_s18, [#allocation6], %s264_s23, %s264_s23, %s265_s24  }
  0x17   :  { %256 = dma.done.wait [#allocation3], 64  }
  0x18   :  { %257 = vsyncadd [#allocation3], 4294967232 }
  0x19   :  { %258 = dma.done.wait [#allocation6], 256  }
  0x1a   :  { %259 = vsyncadd [#allocation6], 4294967040  ;;  %v266_v0 = vmov 0.0   ;;  %vm267_vm0 = vmmov 0   ;;  %v188_v1 = vld [vmem:[#allocation5 + $0x8] sm:$0xff]   ;;  %v189_v2 = vld [vmem:[#allocation5] sm:$0xff]   ;;  %v131_v26 = vlaneseq }
  0x1b   :  { %173 = vmatprep.subr.bf16.mxu0 %v266_v0  ;;  %177 = vmatprep.mubr.msk.bf16.mxu0 %vm267_vm0, %v266_v0  ;;  %v45_v3 = vld [vmem:[#allocation2] sm:$0xf]  ;;  %vm62_vm1 = vcmask 261120  }
  0x1c   :  { %174 = vmatpush3.bf16.msra.mxu0 %v188_v1  ;;  %v132_v27 = vshrl.u32 %v131_v26, 7  ;;  %v125_v28 = vld [vmem:[%s311_s2] sm:$0x1]  ;;  %s268_s2 = smov [#allocation7]  }
  0x1d   :  { %175 = vmatprep.subr.bf16.mxu0 %v266_v0  ;;  %v127_v32 = vld [vmem:[%s312_s3] sm:$0x1]  ;;  %s157_s29 = sshll.u32 %s268_s2, 4  ;;  %s158_s29 = int_to_ptr.vmem [resolvable:$true] %s157_s29 }
  0x1e   :  { %v133_v29 = vsub.s32 0, %v132_v27  ;;  %s236_s30 = scalar_lea.vmem %s158_s29, 128  ;;  %p241_p11 = scmp.lt.s32.totalorder %s158_s29, %s158_s29 }
  0x1f   :  { %p237_p10 = scmp.ne.s32.totalorder %s158_s29, %s236_s30  ;;  %p242_p12 = scmp.lt.s32.totalorder %s236_s30, %s236_s30 }
  0x20   :  { %176 = vmatpush3.bf16.msra.mxu0 %v189_v2 }
  0x21   :  { %p243_p13 = por %p242_p12, %p241_p11 }
  0x23   :  { %178 = vmatmul.mubr.msk.bf16.vlgmr.msra.gmra.mxu0 %vm62_vm1, %v45_v3  ;;  %p244_p0 = pnand %p243_p13, %p237_p10 }
  0xe3   :  { %v100_v4 = vpop.f32.mrf.mxu0 }
  0xe4   :  { %v106_v5 = vrot.slane %v100_v4, 4  ;;  %v113_v6 = vmul.f32 %v100_v4, %v100_v4 }
  0xe5   :  { %v179_v7 = vpop.f32.mrf.mxu0 }
  0xe6   :  { %v107_v8 = vadd.f32 %v106_v5, %v100_v4  ;;  %v114_v9 = vrot.slane %v113_v6, 4 }
  0xe7   :  { %v103_v10 = vpop.f32.mrf.mxu0 }
  0xe8   :  { %v108_v11 = vrot.slane %v107_v8, 2  ;;  %v115_v12 = vadd.f32 %v114_v9, %v113_v6 }
  0xe9   :  { %v180_v13 = vpop.f32.mrf.mxu0 }
  0xea   :  { %v109_v14 = vadd.f32 %v108_v11, %v107_v8  ;;  %v116_v15 = vrot.slane %v115_v12, 2 }
  0xec   :  { %v110_v16 = vrot.slane %v109_v14, 1  ;;  %v117_v17 = vadd.f32 %v116_v15, %v115_v12 }
  0xee   :  { %v111_v18 = vadd.f32 %v110_v16, %v109_v14  ;;  %v118_v19 = vrot.slane %v117_v17, 1 }
  0xf0   :  { %v112_v20 = vmul.f32 0.125, %v111_v18  ;;  %v119_v21 = vadd.f32 %v118_v19, %v117_v17 }
  0xf2   :  { %v120_v22 = vmul.f32 0.125, %v119_v21  ;;  %v121_v23 = vmul.f32 %v112_v20, %v112_v20 }
  0xf4   :  { %v122_v24 = vsub.f32 %v120_v22, %v121_v23 }
  0xf6   :  { %v123_v25 = vadd.f32 1e-05, %v122_v24 }
  0xf8   :  { %190 = vrsqrt.f32 %v123_v25 }
 0x105   :  { %v191_v30 = vpop.eup %190 }
 0x106   :  { %v126_v31 = vmul.f32 %v191_v30, %v125_v28 }
 0x108   :  { %v134_v33 = vrot.slane %v126_v31, %v133_v29  ;;  %v128_v34 = vmul.f32 %v126_v31, %v112_v20 }
 0x10a   :  { %v129_v35 = vsub.f32 %v127_v32, %v128_v34  ;;  %v136_v36 = vmul.f32 %v134_v33, %v100_v4 }
 0x10c   :  { %v141_v37 = vrot.slane %v129_v35, %v133_v29 }
 0x10e   :  { %v143_v38 = vadd.f32 %v141_v37, %v136_v36 }
 0x110   :  { %v144_v39 = vsub.f32 0.0, %v143_v38 }
 0x112   :  { %v145_v40 = vmul.f32 1.442695, %v144_v39 }
 0x114   :  { %192 = vpow2.f32 %v145_v40 }
 0x121   :  { %v193_v41 = vpop.eup %192 }
 0x122   :  { %v147_v42 = vadd.f32 1.0, %v193_v41 }
 0x124   :  { %194 = vrcp.f32 %v147_v42 }
 0x131   :  { %v195_v43 = vpop.eup %194 }
 0x132   :  { %v149_v44 = vmul.f32 %v195_v43, %v143_v38 }
 0x134   :  { %150 = vst [vmem:[#allocation7] sm:$0xff] %v149_v44 }
 0x135   :  { %247 = shalt.err (!%p244_p0)
}
 0x136   :  { %160 = dma.vmem_to_hbm [thread:$0]  %s158_s29, 128, %s313_s4, [#allocation4]  }
 0x137   :  { %260 = dma.done.wait [#allocation4], 128  }
 0x138   :  { %261 = vsyncadd [#allocation4], 4294967168 }
 0x139   :  { %164 = vsyncpa [#allocation3], 1 }
 0x13a   :  { %165 = vsyncpa [#allocation6], 1 }
 0x13b   :  { %166 = vsyncpa [#allocation4], 1 }

</bundles_post_ra>
